<compile_context>
chip_gen: v7x
topology: tpu7x:2x2x1
jax: 0.10.0
libtpu: 0.0.40
codegen_flags: <defaults>
</compile_context>

<pallas_src>
import jax
import jax.numpy as jnp
from jax.experimental import pallas as pl
from jax.experimental.pallas import tpu as pltpu


def _round_up(x, m):
    return (x + m - 1) // m * m


def _sae_kernel(x_ref, w1_ref, b1_ref, w2_ref, b2_ref,
                w3_ref, b3_ref, w4_ref, b4_ref, o_ref):
    cdt = w1_ref.dtype          # matmul-operand (compute) dtype, e.g. bfloat16
    x = x_ref[...].astype(cdt)  # cast in-kernel: no extra HBM copy of x

    # encoder1 + relu   (f32 accumulation, f32 elementwise)
    h = jnp.dot(x, w1_ref[...], preferred_element_type=jnp.float32) + b1_ref[...]
    h = jnp.maximum(h, 0.0)
    # encoder2 + relu
    h = jnp.dot(h.astype(cdt), w2_ref[...], preferred_element_type=jnp.float32) + b2_ref[...]
    h = jnp.maximum(h, 0.0)
    # decoder1 + relu
    h = jnp.dot(h.astype(cdt), w3_ref[...], preferred_element_type=jnp.float32) + b3_ref[...]
    h = jnp.maximum(h, 0.0)
    # decoder2 (no relu)
    z = jnp.dot(h.astype(cdt), w4_ref[...], preferred_element_type=jnp.float32) + b4_ref[...]

    # 1 + 4*sigmoid(z) == 3 + 2*tanh(z/2)  (single EUP transcendental)
    o_ref[...] = (3.0 + 2.0 * jnp.tanh(0.5 * z)).astype(o_ref.dtype)


def prepare_params(params, *, compute_dtype=jnp.bfloat16):
    """One-time preparation: pad every feature dim to a multiple of 128 (lane-dense,
    full MXU tiles) and cast weights to the matmul compute dtype.  Padded weight
    rows/cols and bias entries are zero, so padded activations stay exactly 0
    through the ReLUs.  Call once and reuse the result across forward calls."""
    if params.get("_prepared", False):
        return params
    w1, b1 = params["w1"], params["b1"]
    w2, b2 = params["w2"], params["b2"]
    w3, b3 = params["w3"], params["b3"]
    w4, b4 = params["w4"], params["b4"]
    num_items, hidden1 = w1.shape
    latent = w2.shape[1]
    ni_p, h1_p, lat_p = (_round_up(d, 128) for d in (num_items, hidden1, latent))

    def pad_w(a, rows, cols):
        return jnp.pad(a, ((0, rows - a.shape[0]), (0, cols - a.shape[1]))).astype(compute_dtype)

    def pad_b(a, cols):
        # biases stay f32, zero-padded, shaped (1, N) so they broadcast in-kernel
        return jnp.pad(a, (0, cols - a.shape[0])).reshape(1, cols).astype(jnp.float32)

    return {
        "_prepared": True, "compute_dtype": compute_dtype,
        "num_items": num_items, "hidden1": hidden1, "latent": latent,
        "ni_p": ni_p, "h1_p": h1_p, "lat_p": lat_p,
        "w1": pad_w(w1, ni_p, h1_p), "b1": pad_b(b1, h1_p),
        "w2": pad_w(w2, h1_p, lat_p), "b2": pad_b(b2, lat_p),
        "w3": pad_w(w3, lat_p, h1_p), "b3": pad_b(b3, h1_p),
        "w4": pad_w(w4, h1_p, ni_p), "b4": pad_b(b4, ni_p),
    }


def _device_vmem_budget():
    """Physical VMEM capacity minus headroom for compiler scratch."""
    try:
        cap = int(pltpu.get_tpu_info().vmem_capacity_bytes)
    except Exception:
        cap = 64 << 20  # conservative fallback (v7x per-TC capacity)
    return max(cap - (8 << 20), 16 << 20)


def sparse_autoencoder_forward(x, params, *, tile_b=256, out_dtype=jnp.float32,
                               compute_dtype=jnp.bfloat16,
                               single_buffer_weights=True):
    """x: (B, num_items). params: raw dict (w1..w4, b1..b4) or prepare_params() output."""
    p = prepare_params(params, compute_dtype=compute_dtype)
    cdt = p["compute_dtype"]
    num_items = p["num_items"]
    ni_p, h1_p, lat_p = p["ni_p"], p["h1_p"], p["lat_p"]
    B = x.shape[0]
    assert x.shape[1] == num_items

    wdt_size = jnp.dtype(cdt).itemsize
    x_size = jnp.dtype(x.dtype).itemsize
    o_size = jnp.dtype(out_dtype).itemsize

    weight_bytes = ((p["w1"].size + p["w2"].size + p["w3"].size + p["w4"].size) * wdt_size
                    + (p["b1"].size + p["b2"].size + p["b3"].size + p["b4"].size) * 4)
    wbuf = 1 if single_buffer_weights else 2

    def vmem_est(tb):
        io = 2 * tb * ni_p * (x_size + o_size)               # double-buffered x/out tiles
        act = tb * (h1_p + lat_p + h1_p + ni_p) * 4          # f32 intermediates
        act += tb * (ni_p + h1_p + lat_p + h1_p) * wdt_size  # bf16 matmul operands
        return wbuf * weight_bytes + io + act + (4 << 20)

    vmem_budget = _device_vmem_budget()

    # --- batch tile: large (MXU-friendly), multiple of 16, clamped to the batch.
    tile_b = max(16, _round_up(min(int(tile_b), B), 16))
    # v7x megacore: make sure the "parallel" batch axis has >= 2 tiles of work.
    while tile_b > 16 and pl.cdiv(B, tile_b) < 2:
        tile_b = max(16, _round_up(tile_b // 2, 16))
    # Shrink further if the VMEM estimate blows the device budget.
    while tile_b > 16 and vmem_est(tile_b) > vmem_budget:
        tile_b = max(16, _round_up(tile_b // 2, 16))

    Bp = _round_up(B, tile_b)
    grid = (Bp // tile_b,)

    # Pad x only when ragged (batch or feature dim); aligned case passes straight through.
    if Bp != B or ni_p != num_items:
        x_in = jnp.pad(x, ((0, Bp - B), (0, ni_p - num_items)))
    else:
        x_in = x

    vmem_limit = int(min(max(vmem_est(tile_b), 32 << 20), vmem_budget))

    # --- advisory cost estimate for the XLA scheduler
    flops = 2 * Bp * (ni_p * h1_p + h1_p * lat_p + lat_p * h1_p + h1_p * ni_p)
    bytes_accessed = Bp * ni_p * (x_size + o_size) + weight_bytes
    cost = pl.CostEstimate(flops=int(flops), transcendentals=int(Bp * ni_p),
                           bytes_accessed=int(bytes_accessed))

    def run(single_buffer):
        def wspec(shape):
            if single_buffer:
                # Constant-index blocks are fetched once; one buffer is enough.
                return pl.BlockSpec(shape, lambda i: (0, 0), pipeline_mode=pl.Buffered(1))
            return pl.BlockSpec(shape, lambda i: (0, 0))

        return pl.pallas_call(
            _sae_kernel,
            out_shape=jax.ShapeDtypeStruct((Bp, ni_p), out_dtype),
            grid_spec=pltpu.PrefetchScalarGridSpec(
                num_scalar_prefetch=0,
                grid=grid,
                in_specs=[
                    pl.BlockSpec((tile_b, ni_p), lambda i: (i, 0)),  # x batch tile
                    wspec(p["w1"].shape), wspec(p["b1"].shape),
                    wspec(p["w2"].shape), wspec(p["b2"].shape),
                    wspec(p["w3"].shape), wspec(p["b3"].shape),
                    wspec(p["w4"].shape), wspec(p["b4"].shape),
                ],
                out_specs=pl.BlockSpec((tile_b, ni_p), lambda i: (i, 0)),
            ),
            compiler_params=pltpu.CompilerParams(
                dimension_semantics=("parallel",),   # batch tiles shard across TCs on v7x
                vmem_limit_bytes=vmem_limit),
            cost_estimate=cost,
        )(x_in, p["w1"], p["b1"], p["w2"], p["b2"], p["w3"], p["b3"], p["w4"], p["b4"])

    if single_buffer_weights:
        try:
            out_padded = run(True)
        except Exception:
            # pl.Buffered(1) unsupported on this jax/libtpu build: default buffering.
            out_padded = run(False)
    else:
        out_padded = run(False)

    if Bp == B and ni_p == num_items:
        return out_padded                      # aligned case: no extra slice/copy
    return out_padded[:B, :num_items]


def init_params(key, num_items, latent_dim):
    """Deterministic init matching PyTorch nn.Linear's U(-1/sqrt(fan_in), +1/sqrt(fan_in))."""
    hidden1 = latent_dim * 2

    def linear(key, fan_in, fan_out):
        kw, kb = jax.random.split(key)
        bound = 1.0 / jnp.sqrt(fan_in)
        w = jax.random.uniform(kw, (fan_in, fan_out), jnp.float32, -bound, bound)
        b = jax.random.uniform(kb, (fan_out,), jnp.float32, -bound, bound)
        return w, b

    k1, k2, k3, k4 = jax.random.split(key, 4)
    w1, b1 = linear(k1, num_items, hidden1)   # encoder1
    w2, b2 = linear(k2, hidden1, latent_dim)  # encoder2
    w3, b3 = linear(k3, latent_dim, hidden1)  # decoder1
    w4, b4 = linear(k4, hidden1, num_items)   # decoder2
    return dict(w1=w1, b1=b1, w2=w2, b2=b2, w3=w3, b3=b3, w4=w4, b4=b4)


def reference_forward(x, p, matmul_dtype=jnp.float32):
    def mm(a, w):
        return jnp.dot(a.astype(matmul_dtype), w.astype(matmul_dtype),
                       preferred_element_type=jnp.float32)
    h = jnp.maximum(mm(x, p["w1"]) + p["b1"], 0.0)
    h = jnp.maximum(mm(h, p["w2"]) + p["b2"], 0.0)
    h = jnp.maximum(mm(h, p["w3"]) + p["b3"], 0.0)
    z = mm(h, p["w4"]) + p["b4"]
    return 1.0 + 4.0 * jax.nn.sigmoid(z)


if __name__ == "__main__":
    # Small synthetic shapes consistent with the module:
    # num_items would normally come from num_items.npy; use a small stand-in.
    num_items = 64
    latent_dim = 32   # module default is 377; scaled down for a small test
    batch = 16

    key = jax.random.PRNGKey(0)
    kx, kp = jax.random.split(key)
    x = jax.random.normal(kx, (batch, num_items), jnp.float32)
    params = init_params(kp, num_items, latent_dim)

    prepared = prepare_params(params)   # one-time pad + bf16 cast; reuse across calls
    out = sparse_autoencoder_forward(x, prepared)
    out = jax.block_until_ready(out)
    assert out.shape == (batch, num_items)
    assert out.dtype == jnp.float32

    # Matched-precision reference (same bf16 matmul operands, f32 accumulation):
    ref_bf16 = reference_forward(x, params, matmul_dtype=jnp.bfloat16)
    assert jnp.allclose(out, ref_bf16, atol=2e-3, rtol=2e-3), "mismatch vs bf16 reference"
    # Sanity vs the full-f32 PyTorch-equivalent forward (loose: bf16 rounding):
    ref_f32 = reference_forward(x, params, matmul_dtype=jnp.float32)
    assert jnp.allclose(out, ref_f32, atol=1e-1, rtol=5e-2), "mismatch vs f32 reference"

    print("KERNEL_OK")
</pallas_src>

<mosaic_0001>
module attributes {stable_mosaic.version = 11 : i64} {
  func.func @_sae_kernel(%arg0: i32, %arg1: memref<16x128xf32, #tpu.memory_space<vmem>>, %arg2: memref<128x128xbf16, #tpu.memory_space<vmem>>, %arg3: memref<1x128xf32, #tpu.memory_space<vmem>>, %arg4: memref<128x128xbf16, #tpu.memory_space<vmem>>, %arg5: memref<1x128xf32, #tpu.memory_space<vmem>>, %arg6: memref<128x128xbf16, #tpu.memory_space<vmem>>, %arg7: memref<1x128xf32, #tpu.memory_space<vmem>>, %arg8: memref<128x128xbf16, #tpu.memory_space<vmem>>, %arg9: memref<1x128xf32, #tpu.memory_space<vmem>>, %arg10: memref<16x128xf32, #tpu.memory_space<vmem>>) attributes {dimension_semantics = [#tpu.dimension_semantics<parallel>], iteration_bounds = array<i64: 1>, scalar_prefetch = 0 : i64, scratch_operands = 0 : i64, tpu.core_type = #tpu.core_type<tc>, window_params = [{transform_indices = @transform_0, window_bounds = array<i64: 16, 128>}, {pipeline_mode = #tpu.pipeline_mode<synchronous>, transform_indices = @transform_1, window_bounds = array<i64: 128, 128>}, {pipeline_mode = #tpu.pipeline_mode<synchronous>, transform_indices = @transform_2, window_bounds = array<i64: 1, 128>}, {pipeline_mode = #tpu.pipeline_mode<synchronous>, transform_indices = @transform_3, window_bounds = array<i64: 128, 128>}, {pipeline_mode = #tpu.pipeline_mode<synchronous>, transform_indices = @transform_4, window_bounds = array<i64: 1, 128>}, {pipeline_mode = #tpu.pipeline_mode<synchronous>, transform_indices = @transform_5, window_bounds = array<i64: 128, 128>}, {pipeline_mode = #tpu.pipeline_mode<synchronous>, transform_indices = @transform_6, window_bounds = array<i64: 1, 128>}, {pipeline_mode = #tpu.pipeline_mode<synchronous>, transform_indices = @transform_7, window_bounds = array<i64: 128, 128>}, {pipeline_mode = #tpu.pipeline_mode<synchronous>, transform_indices = @transform_8, window_bounds = array<i64: 1, 128>}, {transform_indices = @transform_9, window_bounds = array<i64: 16, 128>}]} {
    %c0 = arith.constant 0 : index
    %c0_0 = arith.constant 0 : index
    %0 = vector.load %arg1[%c0, %c0_0] : memref<16x128xf32, #tpu.memory_space<vmem>>, vector<16x128xf32>
    %1 = arith.truncf %0 : vector<16x128xf32> to vector<16x128xbf16>
    %c0_1 = arith.constant 0 : index
    %c0_2 = arith.constant 0 : index
    %2 = vector.load %arg2[%c0_1, %c0_2] : memref<128x128xbf16, #tpu.memory_space<vmem>>, vector<128x128xbf16>
    %cst = arith.constant dense<0.000000e+00> : vector<16x128xf32>
    %3 = tpu.matmul %1, %2, %cst {dimension_numbers = #tpu.dot_dimension_numbers<[1], [0], [0], [1], [0, 0, 1, 1], [], []>} : vector<16x128xbf16>, vector<128x128xbf16>, vector<16x128xf32> -> vector<16x128xf32>
    %c0_3 = arith.constant 0 : index
    %c0_4 = arith.constant 0 : index
    %4 = vector.load %arg3[%c0_3, %c0_4] : memref<1x128xf32, #tpu.memory_space<vmem>>, vector<1x128xf32>
    %5 = vector.broadcast %4 : vector<1x128xf32> to vector<16x128xf32>
    %6 = arith.addf %3, %5 : vector<16x128xf32>
    %cst_5 = arith.constant 0.000000e+00 : f32
    %7 = vector.broadcast %cst_5 : f32 to vector<16x128xf32>
    %8 = arith.maximumf %6, %7 : vector<16x128xf32>
    %9 = arith.truncf %8 : vector<16x128xf32> to vector<16x128xbf16>
    %c0_6 = arith.constant 0 : index
    %c0_7 = arith.constant 0 : index
    %10 = vector.load %arg4[%c0_6, %c0_7] : memref<128x128xbf16, #tpu.memory_space<vmem>>, vector<128x128xbf16>
    %cst_8 = arith.constant dense<0.000000e+00> : vector<16x128xf32>
    %11 = tpu.matmul %9, %10, %cst_8 {dimension_numbers = #tpu.dot_dimension_numbers<[1], [0], [0], [1], [0, 0, 1, 1], [], []>} : vector<16x128xbf16>, vector<128x128xbf16>, vector<16x128xf32> -> vector<16x128xf32>
    %c0_9 = arith.constant 0 : index
    %c0_10 = arith.constant 0 : index
    %12 = vector.load %arg5[%c0_9, %c0_10] : memref<1x128xf32, #tpu.memory_space<vmem>>, vector<1x128xf32>
    %13 = vector.broadcast %12 : vector<1x128xf32> to vector<16x128xf32>
    %14 = arith.addf %11, %13 : vector<16x128xf32>
    %cst_11 = arith.constant 0.000000e+00 : f32
    %15 = vector.broadcast %cst_11 : f32 to vector<16x128xf32>
    %16 = arith.maximumf %14, %15 : vector<16x128xf32>
    %17 = arith.truncf %16 : vector<16x128xf32> to vector<16x128xbf16>
    %c0_12 = arith.constant 0 : index
    %c0_13 = arith.constant 0 : index
    %18 = vector.load %arg6[%c0_12, %c0_13] : memref<128x128xbf16, #tpu.memory_space<vmem>>, vector<128x128xbf16>
    %cst_14 = arith.constant dense<0.000000e+00> : vector<16x128xf32>
    %19 = tpu.matmul %17, %18, %cst_14 {dimension_numbers = #tpu.dot_dimension_numbers<[1], [0], [0], [1], [0, 0, 1, 1], [], []>} : vector<16x128xbf16>, vector<128x128xbf16>, vector<16x128xf32> -> vector<16x128xf32>
    %c0_15 = arith.constant 0 : index
    %c0_16 = arith.constant 0 : index
    %20 = vector.load %arg7[%c0_15, %c0_16] : memref<1x128xf32, #tpu.memory_space<vmem>>, vector<1x128xf32>
    %21 = vector.broadcast %20 : vector<1x128xf32> to vector<16x128xf32>
    %22 = arith.addf %19, %21 : vector<16x128xf32>
    %cst_17 = arith.constant 0.000000e+00 : f32
    %23 = vector.broadcast %cst_17 : f32 to vector<16x128xf32>
    %24 = arith.maximumf %22, %23 : vector<16x128xf32>
    %25 = arith.truncf %24 : vector<16x128xf32> to vector<16x128xbf16>
    %c0_18 = arith.constant 0 : index
    %c0_19 = arith.constant 0 : index
    %26 = vector.load %arg8[%c0_18, %c0_19] : memref<128x128xbf16, #tpu.memory_space<vmem>>, vector<128x128xbf16>
    %cst_20 = arith.constant dense<0.000000e+00> : vector<16x128xf32>
    %27 = tpu.matmul %25, %26, %cst_20 {dimension_numbers = #tpu.dot_dimension_numbers<[1], [0], [0], [1], [0, 0, 1, 1], [], []>} : vector<16x128xbf16>, vector<128x128xbf16>, vector<16x128xf32> -> vector<16x128xf32>
    %c0_21 = arith.constant 0 : index
    %c0_22 = arith.constant 0 : index
    %28 = vector.load %arg9[%c0_21, %c0_22] : memref<1x128xf32, #tpu.memory_space<vmem>>, vector<1x128xf32>
    %29 = vector.broadcast %28 : vector<1x128xf32> to vector<16x128xf32>
    %30 = arith.addf %27, %29 : vector<16x128xf32>
    %cst_23 = arith.constant 5.000000e-01 : f32
    %31 = vector.broadcast %cst_23 : f32 to vector<16x128xf32>
    %32 = arith.mulf %31, %30 : vector<16x128xf32>
    %33 = math.tanh %32 : vector<16x128xf32>
    %cst_24 = arith.constant 2.000000e+00 : f32
    %34 = vector.broadcast %cst_24 : f32 to vector<16x128xf32>
    %35 = arith.mulf %34, %33 : vector<16x128xf32>
    %cst_25 = arith.constant 3.000000e+00 : f32
    %36 = vector.broadcast %cst_25 : f32 to vector<16x128xf32>
    %37 = arith.addf %36, %35 : vector<16x128xf32>
    %c0_26 = arith.constant 0 : index
    %c0_27 = arith.constant 0 : index
    %38 = vector.load %arg10[%c0_26, %c0_27] : memref<16x128xf32, #tpu.memory_space<vmem>>, vector<16x128xf32>
    tpu.vector_store %arg10[%c0_26, %c0_27], %37 {strides = array<i32>} : memref<16x128xf32, #tpu.memory_space<vmem>>, vector<16x128xf32>,
    return
  }
  func.func @transform_0(%arg0: i32) -> (i32, i32) {
    %c0_i32 = arith.constant 0 : i32
    %c0_i32_0 = arith.constant 0 : i32
    return %arg0, %c0_i32 : i32, i32
  }
  func.func @transform_1(%arg0: i32) -> (i32, i32) {
    %c0_i32 = arith.constant 0 : i32
    %c0_i32_0 = arith.constant 0 : i32
    %c0_i32_1 = arith.constant 0 : i32
    return %c0_i32, %c0_i32_0 : i32, i32
  }
  func.func @transform_2(%arg0: i32) -> (i32, i32) {
    %c0_i32 = arith.constant 0 : i32
    %c0_i32_0 = arith.constant 0 : i32
    %c0_i32_1 = arith.constant 0 : i32
    return %c0_i32, %c0_i32_0 : i32, i32
  }
  func.func @transform_3(%arg0: i32) -> (i32, i32) {
    %c0_i32 = arith.constant 0 : i32
    %c0_i32_0 = arith.constant 0 : i32
    %c0_i32_1 = arith.constant 0 : i32
    return %c0_i32, %c0_i32_0 : i32, i32
  }
  func.func @transform_4(%arg0: i32) -> (i32, i32) {
    %c0_i32 = arith.constant 0 : i32
    %c0_i32_0 = arith.constant 0 : i32
    %c0_i32_1 = arith.constant 0 : i32
    return %c0_i32, %c0_i32_0 : i32, i32
  }
  func.func @transform_5(%arg0: i32) -> (i32, i32) {
    %c0_i32 = arith.constant 0 : i32
    %c0_i32_0 = arith.constant 0 : i32
    %c0_i32_1 = arith.constant 0 : i32
    return %c0_i32, %c0_i32_0 : i32, i32
  }
  func.func @transform_6(%arg0: i32) -> (i32, i32) {
    %c0_i32 = arith.constant 0 : i32
    %c0_i32_0 = arith.constant 0 : i32
    %c0_i32_1 = arith.constant 0 : i32
    return %c0_i32, %c0_i32_0 : i32, i32
  }
  func.func @transform_7(%arg0: i32) -> (i32, i32) {
    %c0_i32 = arith.constant 0 : i32
    %c0_i32_0 = arith.constant 0 : i32
    %c0_i32_1 = arith.constant 0 : i32
    return %c0_i32, %c0_i32_0 : i32, i32
  }
  func.func @transform_8(%arg0: i32) -> (i32, i32) {
    %c0_i32 = arith.constant 0 : i32
    %c0_i32_0 = arith.constant 0 : i32
    %c0_i32_1 = arith.constant 0 : i32
    return %c0_i32, %c0_i32_0 : i32, i32
  }
  func.func @transform_9(%arg0: i32) -> (i32, i32) {
    %c0_i32 = arith.constant 0 : i32
    %c0_i32_0 = arith.constant 0 : i32
    return %arg0, %c0_i32 : i32, i32
  }
}

module attributes {stable_mosaic.version = 11 : i64} {
  func.func @_sae_kernel(%arg0: i32, %arg1: memref<16x128xf32, #tpu.memory_space<vmem>>, %arg2: memref<128x128xbf16, #tpu.memory_space<vmem>>, %arg3: memref<1x128xf32, #tpu.memory_space<vmem>>, %arg4: memref<128x128xbf16, #tpu.memory_space<vmem>>, %arg5: memref<1x128xf32, #tpu.memory_space<vmem>>, %arg6: memref<128x128xbf16, #tpu.memory_space<vmem>>, %arg7: memref<1x128xf32, #tpu.memory_space<vmem>>, %arg8: memref<128x128xbf16, #tpu.memory_space<vmem>>, %arg9: memref<1x128xf32, #tpu.memory_space<vmem>>, %arg10: memref<16x128xf32, #tpu.memory_space<vmem>>) attributes {dimension_semantics = [#tpu.dimension_semantics<parallel>], iteration_bounds = array<i64: 1>, scalar_prefetch = 0 : i64, scratch_operands = 0 : i64, tpu.core_type = #tpu.core_type<tc>, window_params = [{transform_indices = @transform_0, window_bounds = array<i64: 16, 128>}, {pipeline_mode = #tpu.pipeline_mode<synchronous>, transform_indices = @transform_1, window_bounds = array<i64: 128, 128>}, {pipeline_mode = #tpu.pipeline_mode<synchronous>, transform_indices = @transform_2, window_bounds = array<i64: 1, 128>}, {pipeline_mode = #tpu.pipeline_mode<synchronous>, transform_indices = @transform_3, window_bounds = array<i64: 128, 128>}, {pipeline_mode = #tpu.pipeline_mode<synchronous>, transform_indices = @transform_4, window_bounds = array<i64: 1, 128>}, {pipeline_mode = #tpu.pipeline_mode<synchronous>, transform_indices = @transform_5, window_bounds = array<i64: 128, 128>}, {pipeline_mode = #tpu.pipeline_mode<synchronous>, transform_indices = @transform_6, window_bounds = array<i64: 1, 128>}, {pipeline_mode = #tpu.pipeline_mode<synchronous>, transform_indices = @transform_7, window_bounds = array<i64: 128, 128>}, {pipeline_mode = #tpu.pipeline_mode<synchronous>, transform_indices = @transform_8, window_bounds = array<i64: 1, 128>}, {transform_indices = @transform_9, window_bounds = array<i64: 16, 128>}]} {
    %c0 = arith.constant 0 : index
    %c0_0 = arith.constant 0 : index
    %0 = vector.load %arg1[%c0, %c0_0] : memref<16x128xf32, #tpu.memory_space<vmem>>, vector<16x128xf32>
    %1 = arith.truncf %0 : vector<16x128xf32> to vector<16x128xbf16>
    %c0_1 = arith.constant 0 : index
    %c0_2 = arith.constant 0 : index
    %2 = vector.load %arg2[%c0_1, %c0_2] : memref<128x128xbf16, #tpu.memory_space<vmem>>, vector<128x128xbf16>
    %cst = arith.constant dense<0.000000e+00> : vector<16x128xf32>
    %3 = tpu.matmul %1, %2, %cst {dimension_numbers = #tpu.dot_dimension_numbers<[1], [0], [0], [1], [0, 0, 1, 1], [], []>} : vector<16x128xbf16>, vector<128x128xbf16>, vector<16x128xf32> -> vector<16x128xf32>
    %c0_3 = arith.constant 0 : index
    %c0_4 = arith.constant 0 : index
    %4 = vector.load %arg3[%c0_3, %c0_4] : memref<1x128xf32, #tpu.memory_space<vmem>>, vector<1x128xf32>
    %5 = vector.broadcast %4 : vector<1x128xf32> to vector<16x128xf32>
    %6 = arith.addf %3, %5 : vector<16x128xf32>
    %cst_5 = arith.constant 0.000000e+00 : f32
    %7 = vector.broadcast %cst_5 : f32 to vector<16x128xf32>
    %8 = arith.maximumf %6, %7 : vector<16x128xf32>
    %9 = arith.truncf %8 : vector<16x128xf32> to vector<16x128xbf16>
    %c0_6 = arith.constant 0 : index
    %c0_7 = arith.constant 0 : index
    %10 = vector.load %arg4[%c0_6, %c0_7] : memref<128x128xbf16, #tpu.memory_space<vmem>>, vector<128x128xbf16>
    %cst_8 = arith.constant dense<0.000000e+00> : vector<16x128xf32>
    %11 = tpu.matmul %9, %10, %cst_8 {dimension_numbers = #tpu.dot_dimension_numbers<[1], [0], [0], [1], [0, 0, 1, 1], [], []>} : vector<16x128xbf16>, vector<128x128xbf16>, vector<16x128xf32> -> vector<16x128xf32>
    %c0_9 = arith.constant 0 : index
    %c0_10 = arith.constant 0 : index
    %12 = vector.load %arg5[%c0_9, %c0_10] : memref<1x128xf32, #tpu.memory_space<vmem>>, vector<1x128xf32>
    %13 = vector.broadcast %12 : vector<1x128xf32> to vector<16x128xf32>
    %14 = arith.addf %11, %13 : vector<16x128xf32>
    %cst_11 = arith.constant 0.000000e+00 : f32
    %15 = vector.broadcast %cst_11 : f32 to vector<16x128xf32>
    %16 = arith.maximumf %14, %15 : vector<16x128xf32>
    %17 = arith.truncf %16 : vector<16x128xf32> to vector<16x128xbf16>
    %c0_12 = arith.constant 0 : index
    %c0_13 = arith.constant 0 : index
    %18 = vector.load %arg6[%c0_12, %c0_13] : memref<128x128xbf16, #tpu.memory_space<vmem>>, vector<128x128xbf16>
    %cst_14 = arith.constant dense<0.000000e+00> : vector<16x128xf32>
    %19 = tpu.matmul %17, %18, %cst_14 {dimension_numbers = #tpu.dot_dimension_numbers<[1], [0], [0], [1], [0, 0, 1, 1], [], []>} : vector<16x128xbf16>, vector<128x128xbf16>, vector<16x128xf32> -> vector<16x128xf32>
    %c0_15 = arith.constant 0 : index
    %c0_16 = arith.constant 0 : index
    %20 = vector.load %arg7[%c0_15, %c0_16] : memref<1x128xf32, #tpu.memory_space<vmem>>, vector<1x128xf32>
    %21 = vector.broadcast %20 : vector<1x128xf32> to vector<16x128xf32>
    %22 = arith.addf %19, %21 : vector<16x128xf32>
    %cst_17 = arith.constant 0.000000e+00 : f32
    %23 = vector.broadcast %cst_17 : f32 to vector<16x128xf32>
    %24 = arith.maximumf %22, %23 : vector<16x128xf32>
    %25 = arith.truncf %24 : vector<16x128xf32> to vector<16x128xbf16>
    %c0_18 = arith.constant 0 : index
    %c0_19 = arith.constant 0 : index
    %26 = vector.load %arg8[%c0_18, %c0_19] : memref<128x128xbf16, #tpu.memory_space<vmem>>, vector<128x128xbf16>
    %cst_20 = arith.constant dense<0.000000e+00> : vector<16x128xf32>
    %27 = tpu.matmul %25, %26, %cst_20 {dimension_numbers = #tpu.dot_dimension_numbers<[1], [0], [0], [1], [0, 0, 1, 1], [], []>} : vector<16x128xbf16>, vector<128x128xbf16>, vector<16x128xf32> -> vector<16x128xf32>
    %c0_21 = arith.constant 0 : index
    %c0_22 = arith.constant 0 : index
    %28 = vector.load %arg9[%c0_21, %c0_22] : memref<1x128xf32, #tpu.memory_space<vmem>>, vector<1x128xf32>
    %29 = vector.broadcast %28 : vector<1x128xf32> to vector<16x128xf32>
    %30 = arith.addf %27, %29 : vector<16x128xf32>
    %cst_23 = arith.constant 5.000000e-01 : f32
    %31 = vector.broadcast %cst_23 : f32 to vector<16x128xf32>
    %32 = arith.mulf %31, %30 : vector<16x128xf32>
    %33 = math.tanh %32 : vector<16x128xf32>
    %cst_24 = arith.constant 2.000000e+00 : f32
    %34 = vector.broadcast %cst_24 : f32 to vector<16x128xf32>
    %35 = arith.mulf %34, %33 : vector<16x128xf32>
    %cst_25 = arith.constant 3.000000e+00 : f32
    %36 = vector.broadcast %cst_25 : f32 to vector<16x128xf32>
    %37 = arith.addf %36, %35 : vector<16x128xf32>
    %c0_26 = arith.constant 0 : index
    %c0_27 = arith.constant 0 : index
    %38 = vector.load %arg10[%c0_26, %c0_27] : memref<16x128xf32, #tpu.memory_space<vmem>>, vector<16x128xf32>
    tpu.vector_store %arg10[%c0_26, %c0_27], %37 {strides = array<i32>} : memref<16x128xf32, #tpu.memory_space<vmem>>, vector<16x128xf32>,
    return
  }
  func.func @transform_0(%arg0: i32) -> (i32, i32) {
    %c0_i32 = arith.constant 0 : i32
    %c0_i32_0 = arith.constant 0 : i32
    return %arg0, %c0_i32 : i32, i32
  }
  func.func @transform_1(%arg0: i32) -> (i32, i32) {
    %c0_i32 = arith.constant 0 : i32
    %c0_i32_0 = arith.constant 0 : i32
    %c0_i32_1 = arith.constant 0 : i32
    return %c0_i32, %c0_i32_0 : i32, i32
  }
  func.func @transform_2(%arg0: i32) -> (i32, i32) {
    %c0_i32 = arith.constant 0 : i32
    %c0_i32_0 = arith.constant 0 : i32
    %c0_i32_1 = arith.constant 0 : i32
    return %c0_i32, %c0_i32_0 : i32, i32
  }
  func.func @transform_3(%arg0: i32) -> (i32, i32) {
    %c0_i32 = arith.constant 0 : i32
    %c0_i32_0 = arith.constant 0 : i32
    %c0_i32_1 = arith.constant 0 : i32
    return %c0_i32, %c0_i32_0 : i32, i32
  }
  func.func @transform_4(%arg0: i32) -> (i32, i32) {
    %c0_i32 = arith.constant 0 : i32
    %c0_i32_0 = arith.constant 0 : i32
    %c0_i32_1 = arith.constant 0 : i32
    return %c0_i32, %c0_i32_0 : i32, i32
  }
  func.func @transform_5(%arg0: i32) -> (i32, i32) {
    %c0_i32 = arith.constant 0 : i32
    %c0_i32_0 = arith.constant 0 : i32
    %c0_i32_1 = arith.constant 0 : i32
    return %c0_i32, %c0_i32_0 : i32, i32
  }
  func.func @transform_6(%arg0: i32) -> (i32, i32) {
    %c0_i32 = arith.constant 0 : i32
    %c0_i32_0 = arith.constant 0 : i32
    %c0_i32_1 = arith.constant 0 : i32
    return %c0_i32, %c0_i32_0 : i32, i32
  }
  func.func @transform_7(%arg0: i32) -> (i32, i32) {
    %c0_i32 = arith.constant 0 : i32
    %c0_i32_0 = arith.constant 0 : i32
    %c0_i32_1 = arith.constant 0 : i32
    return %c0_i32, %c0_i32_0 : i32, i32
  }
  func.func @transform_8(%arg0: i32) -> (i32, i32) {
    %c0_i32 = arith.constant 0 : i32
    %c0_i32_0 = arith.constant 0 : i32
    %c0_i32_1 = arith.constant 0 : i32
    return %c0_i32, %c0_i32_0 : i32, i32
  }
  func.func @transform_9(%arg0: i32) -> (i32, i32) {
    %c0_i32 = arith.constant 0 : i32
    %c0_i32_0 = arith.constant 0 : i32
    return %arg0, %c0_i32 : i32, i32
  }
}

</mosaic_0001>

<bundles_post_ra>
// kernel: tpu_custom_call.1
= control target key start
LH: loop header
LB: loop body
LE: loop exit
PB: predicated region body
PF: predicated region fallthrough
CT: control target
= control target key end

     0   :  { %14 = vsyncpa [#allocation3], 0  ;;  %s1135_s0 = inlined_call_operand.hbm [shape: f32[16,128], index: 0, kind: input, shape index: {}]   ;;  %s1136_s1 = inlined_call_operand.hbm [shape: bf16[128,128], index: 1, kind: input, shape index: {}]   ;;  %s1137_s2 = inlined_call_operand.vmem [shape: f32[1,128], index: 2, kind: input, shape index: {}]   ;;  %s1138_s3 = inlined_call_operand.hbm [shape: bf16[128,128], index: 3, kind: input, shape index: {}]   ;;  %s1139_s4 = inlined_call_operand.vmem [shape: f32[1,128], index: 4, kind: input, shape index: {}]   ;;  %s1140_s5 = inlined_call_operand.hbm [shape: bf16[128,128], index: 5, kind: input, shape index: {}]   ;;  %s1141_s6 = inlined_call_operand.vmem [shape: f32[1,128], index: 6, kind: input, shape index: {}]   ;;  %s1142_s7 = inlined_call_operand.hbm [shape: bf16[128,128], index: 7, kind: input, shape index: {}]   ;;  %s1143_s8 = inlined_call_operand.vmem [shape: f32[1,128], index: 8, kind: input, shape index: {}]   ;;  %s1144_s9 = inlined_call_operand.hbm [shape: f32[16,128], index: 9, kind: output, shape index: {}]  }
   0x1   :  { %15 = vsyncpa [#allocation6], 0 }
   0x2   :  { %16 = vsyncpa [#allocation9], 0 }
   0x3   :  { %17 = vsyncpa [#allocation4], 0  ;;  %s931_s30 = smov [#allocation5]   ;;  %s791_s13 = scalar_lea.hbm %s1136_s1, 1024 }
   0x4   :  { %s35_s10 = sshll.u32 %s931_s30, 4  ;;  %p792_p0 = scmp.ne.s32.totalorder %s1136_s1, %s791_s13  ;;  %s36_s10 = int_to_ptr.vmem [resolvable:$true] %s35_s10 }
   0x5   :  { %p795_p1 = scmp.lt.u32.totalorder %s791_s13, %s1136_s1 }
   0x7   :  { %p797_p2 = pnand %p795_p1, %p792_p0 }
   0x9   :  { %800 = shalt.err (!%p797_p2)
}
   0xa   :  { %s801_s18 = scalar_lea.vmem %s36_s10, 1024  ;;  %p806_p4 = scmp.lt.s32.totalorder %s36_s10, %s36_s10 }
   0xb   :  { %p802_p3 = scmp.ne.s32.totalorder %s36_s10, %s801_s18  ;;  %p807_p5 = scmp.lt.s32.totalorder %s801_s18, %s801_s18 }
   0xd   :  { %p808_p6 = por %p807_p5, %p806_p4 }
   0xf   :  { %p809_p7 = pnand %p808_p6, %p802_p3 }
  0x11   :  { %812 = shalt.err (!%p809_p7)
}
  0x12   :  { %s932_s19 = smov 64   ;;  %s933_s20 = smov 4  }
  0x13   :  { %41 = dma.hbm_to_vmem [thread:$0]  %s1136_s1, 1024, %s36_s10, [#allocation6], %s932_s19, %s932_s19, %s933_s20  }
  0x14   :  { %s934_s23 = smov [#allocation8]   ;;  %s935_s25 = smov [#allocation2]  }
  0x15   :  { %s63_s24 = sshll.u32 %s934_s23, 4  ;;  %s23_s26 = sshll.u32 %s935_s25, 4  ;;  %s64_s24 = int_to_ptr.vmem [resolvable:$true] %s63_s24  ;;  %s24_s26 = int_to_ptr.vmem [resolvable:$true] %s23_s26 }
  0x16   :  { %s813_s29 = scalar_lea.hbm %s1140_s5, 1024 }
  0x17   :  { %p814_p8 = scmp.ne.s32.totalorder %s1140_s5, %s813_s29  ;;  %p817_p9 = scmp.lt.u32.totalorder %s813_s29, %s1140_s5 }
  0x19   :  { %p819_p10 = pnand %p817_p9, %p814_p8 }
  0x1b   :  { %822 = shalt.err (!%p819_p10)
}
  0x1c   :  { %s823_s1 = scalar_lea.vmem %s64_s24, 1024  ;;  %p828_p12 = scmp.lt.s32.totalorder %s64_s24, %s64_s24 }
  0x1d   :  { %p824_p11 = scmp.ne.s32.totalorder %s64_s24, %s823_s1  ;;  %p829_p13 = scmp.lt.s32.totalorder %s823_s1, %s823_s1 }
  0x1f   :  { %p830_p0 = por %p829_p13, %p828_p12 }
  0x21   :  { %p831_p1 = pnand %p830_p0, %p824_p11 }
  0x23   :  { %834 = shalt.err (!%p831_p1)
}
  0x24   :  { %69 = dma.hbm_to_vmem [thread:$0]  %s1140_s5, 1024, %s64_s24, [#allocation9], %s932_s19, %s932_s19, %s933_s20  }
  0x25   :  { %s835_s17 = scalar_lea.hbm %s1135_s0, 256 }
  0x26   :  { %p836_p2 = scmp.ne.s32.totalorder %s1135_s0, %s835_s17  ;;  %p839_p3 = scmp.lt.u32.totalorder %s835_s17, %s1135_s0 }
  0x28   :  { %p841_p4 = pnand %p839_p3, %p836_p2 }
  0x2a   :  { %844 = shalt.err (!%p841_p4)
}
  0x2b   :  { %s845_s25 = scalar_lea.vmem %s24_s26, 256  ;;  %p850_p6 = scmp.lt.s32.totalorder %s24_s26, %s24_s26 }
  0x2c   :  { %p846_p5 = scmp.ne.s32.totalorder %s24_s26, %s845_s25  ;;  %p851_p7 = scmp.lt.s32.totalorder %s845_s25, %s845_s25 }
  0x2e   :  { %p852_p8 = por %p851_p7, %p850_p6 }
  0x30   :  { %p853_p9 = pnand %p852_p8, %p846_p5 }
  0x32   :  { %856 = shalt.err (!%p853_p9)
}
  0x33   :  { %s936_s5 = smov 128   ;;  %s937_s24 = smov 8  }
  0x34   :  { %29 = dma.hbm_to_vmem [thread:$0]  %s1135_s0, 256, %s24_s26, [#allocation3], %s936_s5, %s936_s5, %s937_s24  }
  0x35   :  { %s938_s29 = smov [#allocation7]   ;;  %s939_s11 = smov [#allocation10]  }
  0x36   :  { %s49_s30 = sshll.u32 %s938_s29, 4  ;;  %s77_s12 = sshll.u32 %s939_s11, 4  ;;  %s50_s30 = int_to_ptr.vmem [resolvable:$true] %s49_s30  ;;  %s78_s12 = int_to_ptr.vmem [resolvable:$true] %s77_s12 }
  0x37   :  { %s857_s10 = scalar_lea.hbm %s1138_s3, 1024 }
  0x38   :  { %p858_p10 = scmp.ne.s32.totalorder %s1138_s3, %s857_s10  ;;  %p861_p11 = scmp.lt.u32.totalorder %s857_s10, %s1138_s3 }
  0x3a   :  { %p863_p12 = pnand %p861_p11, %p858_p10 }
  0x3c   :  { %866 = shalt.err (!%p863_p12)
}
  0x3d   :  { %s867_s0 = scalar_lea.vmem %s50_s30, 1024  ;;  %p872_p0 = scmp.lt.s32.totalorder %s50_s30, %s50_s30 }
  0x3e   :  { %p868_p13 = scmp.ne.s32.totalorder %s50_s30, %s867_s0  ;;  %p873_p1 = scmp.lt.s32.totalorder %s867_s0, %s867_s0 }
  0x40   :  { %p874_p2 = por %p873_p1, %p872_p0 }
  0x42   :  { %p875_p3 = pnand %p874_p2, %p868_p13 }
  0x44   :  { %878 = shalt.err (!%p875_p3)
}
  0x45   :  { %55 = dma.hbm_to_vmem [thread:$0]  %s1138_s3, 1024, %s50_s30, [#allocation6], %s932_s19, %s932_s19, %s933_s20  }
  0x46   :  { %s879_s23 = scalar_lea.hbm %s1142_s7, 1024 }
  0x47   :  { %p880_p4 = scmp.ne.s32.totalorder %s1142_s7, %s879_s23  ;;  %p883_p5 = scmp.lt.u32.totalorder %s879_s23, %s1142_s7 }
  0x49   :  { %p885_p6 = pnand %p883_p5, %p880_p4 }
  0x4b   :  { %888 = shalt.err (!%p885_p6)
}
  0x4c   :  { %s889_s11 = scalar_lea.vmem %s78_s12, 1024  ;;  %p894_p8 = scmp.lt.s32.totalorder %s78_s12, %s78_s12 }
  0x4d   :  { %p890_p7 = scmp.ne.s32.totalorder %s78_s12, %s889_s11  ;;  %p895_p9 = scmp.lt.s32.totalorder %s889_s11, %s889_s11 }
  0x4f   :  { %p896_p10 = por %p895_p9, %p894_p8 }
  0x51   :  { %p897_p11 = pnand %p896_p10, %p890_p7 }
  0x53   :  { %900 = shalt.err (!%p897_p11)
}
  0x54   :  { %83 = dma.hbm_to_vmem [thread:$0]  %s1142_s7, 1024, %s78_s12, [#allocation9], %s932_s19, %s932_s19, %s933_s20  }
  0x55   :  { %923 = dma.done.wait [#allocation3], 256  }
  0x56   :  { %924 = vsyncadd [#allocation3], 4294967040 }
  0x57   :  { %925 = dma.done.wait [#allocation6], 2048  }
  0x58   :  { %926 = vsyncadd [#allocation6], 4294965248 }
  0x59   :  { %927 = dma.done.wait [#allocation9], 2048  }
  0x5a   :  { %928 = vsyncadd [#allocation9], 4294965248  ;;  %v940_v0 = vmov 0.0   ;;  %vm941_vm0 = vmmov 0   ;;  %v755_v1 = vld [vmem:[#allocation5] sm:$0xff]   ;;  %v756_v2 = vld [vmem:[#allocation5 + $0x8] sm:$0xff]  }
  0x5b   :  { %663 = vmatprep.subr.bf16.mxu0 %v940_v0  ;;  %679 = vmatprep.mubr.msk.bf16.mxu0 %vm941_vm0, %v940_v0  ;;  %v757_v3 = vld [vmem:[#allocation5 + $0x10] sm:$0xff]   ;;  %v763_v4 = vld [vmem:[#allocation7] sm:$0xff]   ;;  %v758_v5 = vld [vmem:[#allocation5 + $0x18] sm:$0xff]  }
  0x5c   :  { %683 = vmatprep.subr.bf16.mxu1 %v940_v0  ;;  %699 = vmatprep.mubr.msk.bf16.mxu1 %vm941_vm0, %v940_v0  ;;  %v764_v6 = vld [vmem:[#allocation7 + $0x8] sm:$0xff]   ;;  %v759_v7 = vld [vmem:[#allocation5 + $0x20] sm:$0xff]   ;;  %v765_v8 = vld [vmem:[#allocation7 + $0x10] sm:$0xff]  }
  0x5d   :  { %664 = vmatpush3.bf16.msra.mxu0 %v755_v1  ;;  %684 = vmatpush3.bf16.msra.mxu1 %v763_v4  ;;  %v760_v9 = vld [vmem:[#allocation5 + $0x28] sm:$0xff]   ;;  %v766_v10 = vld [vmem:[#allocation7 + $0x18] sm:$0xff]   ;;  %v761_v11 = vld [vmem:[#allocation5 + $0x30] sm:$0xff]  }
  0x5e   :  { %665 = vmatprep.subr.bf16.mxu0 %v940_v0  ;;  %685 = vmatprep.subr.bf16.mxu1 %v940_v0  ;;  %v767_v12 = vld [vmem:[#allocation7 + $0x20] sm:$0xff]   ;;  %v762_v13 = vld [vmem:[#allocation5 + $0x38] sm:$0xff]   ;;  %v102_v14 = vld [vmem:[#allocation2] sm:$0xff] }
  0x5f   :  { %v103_v15 = vld [vmem:[#allocation2 + $0x8] sm:$0xff]  ;;  %v768_v16 = vld [vmem:[#allocation7 + $0x28] sm:$0xff]   ;;  %v769_v18 = vld [vmem:[#allocation7 + $0x30] sm:$0xff]  }
  0x60   :  { %v104_v17 = vpack.c.bf16 %v103_v15, %v102_v14  ;;  %v770_v19 = vld [vmem:[#allocation7 + $0x38] sm:$0xff]   ;;  %v771_v20 = vld [vmem:[#allocation8] sm:$0xff]   ;;  %v772_v21 = vld [vmem:[#allocation8 + $0x8] sm:$0xff]  }
  0x61   :  { %666 = vmatpush3.bf16.msra.mxu0 %v756_v2  ;;  %686 = vmatpush3.bf16.msra.mxu1 %v764_v6  ;;  %v773_v22 = vld [vmem:[#allocation8 + $0x10] sm:$0xff]   ;;  %v774_v23 = vld [vmem:[#allocation8 + $0x18] sm:$0xff]   ;;  %v775_v24 = vld [vmem:[#allocation8 + $0x20] sm:$0xff]  }
  0x62   :  { %667 = vmatprep.subr.bf16.mxu0 %v940_v0  ;;  %687 = vmatprep.subr.bf16.mxu1 %v940_v0  ;;  %v776_v25 = vld [vmem:[#allocation8 + $0x28] sm:$0xff]   ;;  %v591_v26 = vld [vmem:[%s1137_s2] ss:$0 sm:$0xff]  ;;  %v778_v37 = vld [vmem:[#allocation8 + $0x38] sm:$0xff]  }
  0x63   :  { %v777_v36 = vld [vmem:[#allocation8 + $0x30] sm:$0xff]   ;;  %v779_v38 = vld [vmem:[#allocation10] sm:$0xff]   ;;  %v780_v39 = vld [vmem:[#allocation10 + $0x8] sm:$0xff]  }
  0x64   :  { %v781_v40 = vld [vmem:[#allocation10 + $0x10] sm:$0xff]   ;;  %v782_v41 = vld [vmem:[#allocation10 + $0x18] sm:$0xff]   ;;  %v783_v42 = vld [vmem:[#allocation10 + $0x20] sm:$0xff]  }
  0x65   :  { %668 = vmatpush3.bf16.msra.mxu0 %v757_v3  ;;  %688 = vmatpush3.bf16.msra.mxu1 %v765_v8  ;;  %v784_v43 = vld [vmem:[#allocation10 + $0x28] sm:$0xff]   ;;  %v600_v44 = vld [vmem:[%s1139_s4] ss:$0 sm:$0xff]  ;;  %v786_v55 = vld [vmem:[#allocation10 + $0x38] sm:$0xff]  }
  0x66   :  { %669 = vmatprep.subr.bf16.mxu0 %v940_v0  ;;  %689 = vmatprep.subr.bf16.mxu1 %v940_v0  ;;  %v785_v54 = vld [vmem:[#allocation10 + $0x30] sm:$0xff]  }
  0x67   :  { %v609_v56 = vld [vmem:[%s1141_s6] ss:$0 sm:$0xff]  ;;  %s942_s6 = smov [#allocation11]  }
  0x68   :  { %s577_s10 = sshll.u32 %s942_s6, 4  ;;  %s578_s10 = int_to_ptr.vmem [resolvable:$true] %s577_s10 }
  0x69   :  { %670 = vmatpush3.bf16.msra.mxu0 %v758_v5  ;;  %690 = vmatpush3.bf16.msra.mxu1 %v766_v10  ;;  %p906_p13 = scmp.lt.s32.totalorder %s578_s10, %s578_s10 }
  0x6a   :  { %671 = vmatprep.subr.bf16.mxu0 %v940_v0  ;;  %691 = vmatprep.subr.bf16.mxu1 %v940_v0 }
  0x6d   :  { %672 = vmatpush3.bf16.msra.mxu0 %v759_v7  ;;  %692 = vmatpush3.bf16.msra.mxu1 %v767_v12 }
  0x6e   :  { %673 = vmatprep.subr.bf16.mxu0 %v940_v0  ;;  %693 = vmatprep.subr.bf16.mxu1 %v940_v0 }
  0x71   :  { %674 = vmatpush3.bf16.msra.mxu0 %v760_v9  ;;  %694 = vmatpush3.bf16.msra.mxu1 %v768_v16 }
  0x72   :  { %675 = vmatprep.subr.bf16.mxu0 %v940_v0  ;;  %695 = vmatprep.subr.bf16.mxu1 %v940_v0 }
  0x75   :  { %676 = vmatpush3.bf16.msra.mxu0 %v761_v11  ;;  %696 = vmatpush3.bf16.msra.mxu1 %v769_v18 }
  0x76   :  { %677 = vmatprep.subr.bf16.mxu0 %v940_v0  ;;  %697 = vmatprep.subr.bf16.mxu1 %v940_v0 }
  0x79   :  { %678 = vmatpush3.bf16.msra.mxu0 %v762_v13  ;;  %698 = vmatpush3.bf16.msra.mxu1 %v770_v19 }
  0x7a   :  { %703 = vmatprep.subr.bf16.mxu0 %v940_v0  ;;  %723 = vmatprep.subr.bf16.mxu1 %v940_v0 }
  0x7c   :  { %680 = vmatmul.mubr.bf16.vlgmr.msra.gmra.mrb[0].mxu0 %v104_v17 }
  0x7d   :  { %719 = vmatprep.mubr.msk.bf16.mxu0 %vm941_vm0, %v940_v0  ;;  %704 = vmatpush3.bf16.msra.mxu0 %v771_v20 }
  0x7e   :  { %705 = vmatprep.subr.bf16.mxu0 %v940_v0 }
  0x81   :  { %706 = vmatpush3.bf16.msra.mxu0 %v772_v21 }
  0x82   :  { %707 = vmatprep.subr.bf16.mxu0 %v940_v0 }
  0x85   :  { %708 = vmatpush3.bf16.msra.mxu0 %v773_v22 }
  0x86   :  { %709 = vmatprep.subr.bf16.mxu0 %v940_v0 }
  0x89   :  { %710 = vmatpush3.bf16.msra.mxu0 %v774_v23 }
  0x8a   :  { %711 = vmatprep.subr.bf16.mxu0 %v940_v0 }
  0x8d   :  { %712 = vmatpush3.bf16.msra.mxu0 %v775_v24 }
  0x8e   :  { %713 = vmatprep.subr.bf16.mxu0 %v940_v0 }
  0x91   :  { %714 = vmatpush3.bf16.msra.mxu0 %v776_v25 }
  0x92   :  { %715 = vmatprep.subr.bf16.mxu0 %v940_v0 }
  0x95   :  { %716 = vmatpush3.bf16.msra.mxu0 %v777_v36 }
  0x96   :  { %717 = vmatprep.subr.bf16.mxu0 %v940_v0 }
  0x99   :  { %718 = vmatpush3.bf16.msra.mxu0 %v778_v37 }
 0x14f   :  { %v210_v27 = vpop.f32.mrb[0].mxu0 }
 0x150   :  { %v211_v28 = vadd.f32 %v591_v26, %v210_v27  ;;  %v681_v29 = vpop.f32.mrb[1].mxu0 }
 0x151   :  { %v213_v30 = vpop.f32.mrb[2].mxu0 }
 0x152   :  { %v214_v31 = vadd.f32 %v591_v26, %v213_v30  ;;  %v682_v32 = vpop.f32.mrb[3].mxu0  ;;  %v217_v33 = vmax.f32 %v211_v28, 0.0 }
 0x154   :  { %v218_v34 = vmax.f32 %v214_v31, 0.0 }
 0x156   :  { %v219_v35 = vpack.c.bf16 %v218_v34, %v217_v33 }
 0x158   :  { %700 = vmatmul.mubr.bf16.vlgmr.msra.gmra.mrb[0].mxu1 %v219_v35 }
 0x159   :  { %739 = vmatprep.mubr.msk.bf16.mxu1 %vm941_vm0, %v940_v0  ;;  %724 = vmatpush3.bf16.msra.mxu1 %v779_v38 }
 0x15a   :  { %725 = vmatprep.subr.bf16.mxu1 %v940_v0 }
 0x15d   :  { %726 = vmatpush3.bf16.msra.mxu1 %v780_v39 }
 0x15e   :  { %727 = vmatprep.subr.bf16.mxu1 %v940_v0 }
 0x161   :  { %728 = vmatpush3.bf16.msra.mxu1 %v781_v40 }
 0x162   :  { %729 = vmatprep.subr.bf16.mxu1 %v940_v0 }
 0x165   :  { %730 = vmatpush3.bf16.msra.mxu1 %v782_v41 }
 0x166   :  { %731 = vmatprep.subr.bf16.mxu1 %v940_v0 }
 0x169   :  { %732 = vmatpush3.bf16.msra.mxu1 %v783_v42 }
 0x16a   :  { %733 = vmatprep.subr.bf16.mxu1 %v940_v0 }
 0x16d   :  { %734 = vmatpush3.bf16.msra.mxu1 %v784_v43 }
 0x16e   :  { %735 = vmatprep.subr.bf16.mxu1 %v940_v0 }
 0x171   :  { %736 = vmatpush3.bf16.msra.mxu1 %v785_v54 }
 0x172   :  { %737 = vmatprep.subr.bf16.mxu1 %v940_v0  ;;  %v618_v0 = vld [vmem:[%s1143_s8] ss:$0 sm:$0xff]  ;;  %s901_s8 = scalar_lea.vmem %s578_s10, 256 }
 0x173   :  { %p902_p12 = scmp.ne.s32.totalorder %s578_s10, %s901_s8  ;;  %p907_p0 = scmp.lt.s32.totalorder %s901_s8, %s901_s8 }
 0x175   :  { %738 = vmatpush3.bf16.msra.mxu1 %v786_v55  ;;  %p908_p1 = por %p907_p0, %p906_p13 }
 0x177   :  { %p909_p2 = pnand %p908_p1, %p902_p12 }
 0x22b   :  { %v325_v45 = vpop.f32.mrb[0].mxu1 }
 0x22c   :  { %v326_v46 = vadd.f32 %v600_v44, %v325_v45  ;;  %v701_v47 = vpop.f32.mrb[1].mxu1 }
 0x22d   :  { %v328_v48 = vpop.f32.mrb[2].mxu1 }
 0x22e   :  { %v329_v49 = vadd.f32 %v600_v44, %v328_v48  ;;  %v702_v50 = vpop.f32.mrb[3].mxu1  ;;  %v332_v51 = vmax.f32 %v326_v46, 0.0 }
 0x230   :  { %v333_v52 = vmax.f32 %v329_v49, 0.0 }
 0x232   :  { %v334_v53 = vpack.c.bf16 %v333_v52, %v332_v51 }
 0x234   :  { %720 = vmatmul.mubr.bf16.vlgmr.msra.gmra.mrb[4].mxu0 %v334_v53 }
 0x307   :  { %v440_v57 = vpop.f32.mrb[4].mxu0 }
 0x308   :  { %v441_v58 = vadd.f32 %v609_v56, %v440_v57  ;;  %v721_v59 = vpop.f32.mrb[5].mxu0 }
 0x309   :  { %v443_v60 = vpop.f32.mrb[6].mxu0 }
 0x30a   :  { %v444_v61 = vadd.f32 %v609_v56, %v443_v60  ;;  %v722_v62 = vpop.f32.mrb[7].mxu0  ;;  %v447_v63 = vmax.f32 %v441_v58, 0.0 }
 0x30c   :  { %v448_v1 = vmax.f32 %v444_v61, 0.0 }
 0x30e   :  { %v449_v2 = vpack.c.bf16 %v448_v1, %v447_v63 }
 0x310   :  { %740 = vmatmul.mubr.bf16.vlgmr.msra.gmra.mrb[4].mxu1 %v449_v2 }
 0x3e3   :  { %v555_v3 = vpop.f32.mrb[4].mxu1 }
 0x3e4   :  { %v556_v4 = vadd.f32 %v618_v0, %v555_v3  ;;  %v741_v5 = vpop.f32.mrb[5].mxu1 }
 0x3e5   :  { %v558_v6 = vpop.f32.mrb[6].mxu1 }
 0x3e6   :  { %v562_v7 = vmul.f32 0.5, %v556_v4  ;;  %v559_v8 = vadd.f32 %v618_v0, %v558_v6  ;;  %v742_v9 = vpop.f32.mrb[7].mxu1 }
 0x3e8   :  { %787 = vtanh.f32 %v562_v7  ;;  %v563_v10 = vmul.f32 0.5, %v559_v8 }
 0x3ea   :  { %789 = vtanh.f32 %v563_v10 }
 0x3f2   :  { %v788_v11 = vpop.eup %787 }
 0x3f3   :  { %v566_v12 = vmul.f32 2.0, %v788_v11 }
 0x3f4   :  { %v790_v13 = vpop.eup %789 }
 0x3f5   :  { %v568_v14 = vadd.f32 3.0, %v566_v12  ;;  %v567_v15 = vmul.f32 2.0, %v790_v13 }
 0x3f7   :  { %570 = vst [vmem:[#allocation11] sm:$0xff] %v568_v14  ;;  %v569_v16 = vadd.f32 3.0, %v567_v15 }
 0x3f9   :  { %571 = vst [vmem:[#allocation11 + $0x8] sm:$0xff] %v569_v16 }
 0x3fa   :  { %912 = shalt.err (!%p909_p2)
}
 0x3fb   :  { %s913_s16 = scalar_lea.hbm %s1144_s9, 256 }
 0x3fc   :  { %p914_p3 = scmp.ne.s32.totalorder %s1144_s9, %s913_s16  ;;  %p917_p4 = scmp.lt.u32.totalorder %s913_s16, %s1144_s9 }
 0x3fe   :  { %p919_p5 = pnand %p917_p4, %p914_p3 }
 0x400   :  { %922 = shalt.err (!%p919_p5)
}
 0x401   :  { %583 = dma.vmem_to_hbm [thread:$0]  %s578_s10, 256, %s1144_s9, [#allocation4], %s936_s5, %s936_s5, %s937_s24  }
 0x402   :  { %929 = dma.done.wait [#allocation4], 256  }
 0x403   :  { %930 = vsyncadd [#allocation4], 4294967040 }
 0x404   :  { %587 = vsyncpa [#allocation3], 1 }
 0x405   :  { %588 = vsyncpa [#allocation6], 1 }
 0x406   :  { %589 = vsyncpa [#allocation9], 1 }
 0x407   :  { %590 = vsyncpa [#allocation4], 1 }

// kernel: tpu_custom_call.1
= control target key start
LH: loop header
LB: loop body
LE: loop exit
PB: predicated region body
PF: predicated region fallthrough
CT: control target
= control target key end

     0   :  { %14 = vsyncpa [#allocation3], 0  ;;  %s1135_s0 = inlined_call_operand.hbm [shape: f32[16,128], index: 0, kind: input, shape index: {}]   ;;  %s1136_s1 = inlined_call_operand.hbm [shape: bf16[128,128], index: 1, kind: input, shape index: {}]   ;;  %s1137_s2 = inlined_call_operand.vmem [shape: f32[1,128], index: 2, kind: input, shape index: {}]   ;;  %s1138_s3 = inlined_call_operand.hbm [shape: bf16[128,128], index: 3, kind: input, shape index: {}]   ;;  %s1139_s4 = inlined_call_operand.vmem [shape: f32[1,128], index: 4, kind: input, shape index: {}]   ;;  %s1140_s5 = inlined_call_operand.hbm [shape: bf16[128,128], index: 5, kind: input, shape index: {}]   ;;  %s1141_s6 = inlined_call_operand.vmem [shape: f32[1,128], index: 6, kind: input, shape index: {}]   ;;  %s1142_s7 = inlined_call_operand.hbm [shape: bf16[128,128], index: 7, kind: input, shape index: {}]   ;;  %s1143_s8 = inlined_call_operand.vmem [shape: f32[1,128], index: 8, kind: input, shape index: {}]   ;;  %s1144_s9 = inlined_call_operand.hbm [shape: f32[16,128], index: 9, kind: output, shape index: {}]  }
   0x1   :  { %15 = vsyncpa [#allocation6], 0 }
   0x2   :  { %16 = vsyncpa [#allocation9], 0 }
   0x3   :  { %17 = vsyncpa [#allocation4], 0  ;;  %s931_s30 = smov [#allocation5]   ;;  %s791_s13 = scalar_lea.hbm %s1136_s1, 1024 }
   0x4   :  { %s35_s10 = sshll.u32 %s931_s30, 4  ;;  %p792_p0 = scmp.ne.s32.totalorder %s1136_s1, %s791_s13  ;;  %s36_s10 = int_to_ptr.vmem [resolvable:$true] %s35_s10 }
   0x5   :  { %p795_p1 = scmp.lt.u32.totalorder %s791_s13, %s1136_s1 }
   0x7   :  { %p797_p2 = pnand %p795_p1, %p792_p0 }
   0x9   :  { %800 = shalt.err (!%p797_p2)
}
   0xa   :  { %s801_s18 = scalar_lea.vmem %s36_s10, 1024  ;;  %p806_p4 = scmp.lt.s32.totalorder %s36_s10, %s36_s10 }
   0xb   :  { %p802_p3 = scmp.ne.s32.totalorder %s36_s10, %s801_s18  ;;  %p807_p5 = scmp.lt.s32.totalorder %s801_s18, %s801_s18 }
   0xd   :  { %p808_p6 = por %p807_p5, %p806_p4 }
   0xf   :  { %p809_p7 = pnand %p808_p6, %p802_p3 }
  0x11   :  { %812 = shalt.err (!%p809_p7)
}
  0x12   :  { %s932_s19 = smov 64   ;;  %s933_s20 = smov 4  }
  0x13   :  { %41 = dma.hbm_to_vmem [thread:$0]  %s1136_s1, 1024, %s36_s10, [#allocation6], %s932_s19, %s932_s19, %s933_s20  }
  0x14   :  { %s934_s23 = smov [#allocation8]   ;;  %s935_s25 = smov [#allocation2]  }
  0x15   :  { %s63_s24 = sshll.u32 %s934_s23, 4  ;;  %s23_s26 = sshll.u32 %s935_s25, 4  ;;  %s64_s24 = int_to_ptr.vmem [resolvable:$true] %s63_s24  ;;  %s24_s26 = int_to_ptr.vmem [resolvable:$true] %s23_s26 }
  0x16   :  { %s813_s29 = scalar_lea.hbm %s1140_s5, 1024 }
  0x17   :  { %p814_p8 = scmp.ne.s32.totalorder %s1140_s5, %s813_s29  ;;  %p817_p9 = scmp.lt.u32.totalorder %s813_s29, %s1140_s5 }
  0x19   :  { %p819_p10 = pnand %p817_p9, %p814_p8 }
  0x1b   :  { %822 = shalt.err (!%p819_p10)
}
  0x1c   :  { %s823_s1 = scalar_lea.vmem %s64_s24, 1024  ;;  %p828_p12 = scmp.lt.s32.totalorder %s64_s24, %s64_s24 }
  0x1d   :  { %p824_p11 = scmp.ne.s32.totalorder %s64_s24, %s823_s1  ;;  %p829_p13 = scmp.lt.s32.totalorder %s823_s1, %s823_s1 }
  0x1f   :  { %p830_p0 = por %p829_p13, %p828_p12 }
  0x21   :  { %p831_p1 = pnand %p830_p0, %p824_p11 }
  0x23   :  { %834 = shalt.err (!%p831_p1)
}
  0x24   :  { %69 = dma.hbm_to_vmem [thread:$0]  %s1140_s5, 1024, %s64_s24, [#allocation9], %s932_s19, %s932_s19, %s933_s20  }
  0x25   :  { %s835_s17 = scalar_lea.hbm %s1135_s0, 256 }
  0x26   :  { %p836_p2 = scmp.ne.s32.totalorder %s1135_s0, %s835_s17  ;;  %p839_p3 = scmp.lt.u32.totalorder %s835_s17, %s1135_s0 }
  0x28   :  { %p841_p4 = pnand %p839_p3, %p836_p2 }
  0x2a   :  { %844 = shalt.err (!%p841_p4)
}
  0x2b   :  { %s845_s25 = scalar_lea.vmem %s24_s26, 256  ;;  %p850_p6 = scmp.lt.s32.totalorder %s24_s26, %s24_s26 }
  0x2c   :  { %p846_p5 = scmp.ne.s32.totalorder %s24_s26, %s845_s25  ;;  %p851_p7 = scmp.lt.s32.totalorder %s845_s25, %s845_s25 }
  0x2e   :  { %p852_p8 = por %p851_p7, %p850_p6 }
  0x30   :  { %p853_p9 = pnand %p852_p8, %p846_p5 }
  0x32   :  { %856 = shalt.err (!%p853_p9)
}
  0x33   :  { %s936_s5 = smov 128   ;;  %s937_s24 = smov 8  }
  0x34   :  { %29 = dma.hbm_to_vmem [thread:$0]  %s1135_s0, 256, %s24_s26, [#allocation3], %s936_s5, %s936_s5, %s937_s24  }
  0x35   :  { %s938_s29 = smov [#allocation7]   ;;  %s939_s11 = smov [#allocation10]  }
  0x36   :  { %s49_s30 = sshll.u32 %s938_s29, 4  ;;  %s77_s12 = sshll.u32 %s939_s11, 4  ;;  %s50_s30 = int_to_ptr.vmem [resolvable:$true] %s49_s30  ;;  %s78_s12 = int_to_ptr.vmem [resolvable:$true] %s77_s12 }
  0x37   :  { %s857_s10 = scalar_lea.hbm %s1138_s3, 1024 }
  0x38   :  { %p858_p10 = scmp.ne.s32.totalorder %s1138_s3, %s857_s10  ;;  %p861_p11 = scmp.lt.u32.totalorder %s857_s10, %s1138_s3 }
  0x3a   :  { %p863_p12 = pnand %p861_p11, %p858_p10 }
  0x3c   :  { %866 = shalt.err (!%p863_p12)
}
  0x3d   :  { %s867_s0 = scalar_lea.vmem %s50_s30, 1024  ;;  %p872_p0 = scmp.lt.s32.totalorder %s50_s30, %s50_s30 }
  0x3e   :  { %p868_p13 = scmp.ne.s32.totalorder %s50_s30, %s867_s0  ;;  %p873_p1 = scmp.lt.s32.totalorder %s867_s0, %s867_s0 }
  0x40   :  { %p874_p2 = por %p873_p1, %p872_p0 }
  0x42   :  { %p875_p3 = pnand %p874_p2, %p868_p13 }
  0x44   :  { %878 = shalt.err (!%p875_p3)
}
  0x45   :  { %55 = dma.hbm_to_vmem [thread:$0]  %s1138_s3, 1024, %s50_s30, [#allocation6], %s932_s19, %s932_s19, %s933_s20  }
  0x46   :  { %s879_s23 = scalar_lea.hbm %s1142_s7, 1024 }
  0x47   :  { %p880_p4 = scmp.ne.s32.totalorder %s1142_s7, %s879_s23  ;;  %p883_p5 = scmp.lt.u32.totalorder %s879_s23, %s1142_s7 }
  0x49   :  { %p885_p6 = pnand %p883_p5, %p880_p4 }
  0x4b   :  { %888 = shalt.err (!%p885_p6)
}
  0x4c   :  { %s889_s11 = scalar_lea.vmem %s78_s12, 1024  ;;  %p894_p8 = scmp.lt.s32.totalorder %s78_s12, %s78_s12 }
  0x4d   :  { %p890_p7 = scmp.ne.s32.totalorder %s78_s12, %s889_s11  ;;  %p895_p9 = scmp.lt.s32.totalorder %s889_s11, %s889_s11 }
  0x4f   :  { %p896_p10 = por %p895_p9, %p894_p8 }
  0x51   :  { %p897_p11 = pnand %p896_p10, %p890_p7 }
  0x53   :  { %900 = shalt.err (!%p897_p11)
}
  0x54   :  { %83 = dma.hbm_to_vmem [thread:$0]  %s1142_s7, 1024, %s78_s12, [#allocation9], %s932_s19, %s932_s19, %s933_s20  }
  0x55   :  { %923 = dma.done.wait [#allocation3], 256  }
  0x56   :  { %924 = vsyncadd [#allocation3], 4294967040 }
  0x57   :  { %925 = dma.done.wait [#allocation6], 2048  }
  0x58   :  { %926 = vsyncadd [#allocation6], 4294965248 }
  0x59   :  { %927 = dma.done.wait [#allocation9], 2048  }
  0x5a   :  { %928 = vsyncadd [#allocation9], 4294965248  ;;  %v940_v0 = vmov 0.0   ;;  %vm941_vm0 = vmmov 0   ;;  %v755_v1 = vld [vmem:[#allocation5] sm:$0xff]   ;;  %v756_v2 = vld [vmem:[#allocation5 + $0x8] sm:$0xff]  }
  0x5b   :  { %663 = vmatprep.subr.bf16.mxu0 %v940_v0  ;;  %679 = vmatprep.mubr.msk.bf16.mxu0 %vm941_vm0, %v940_v0  ;;  %v757_v3 = vld [vmem:[#allocation5 + $0x10] sm:$0xff]   ;;  %v763_v4 = vld [vmem:[#allocation7] sm:$0xff]   ;;  %v758_v5 = vld [vmem:[#allocation5 + $0x18] sm:$0xff]  }
  0x5c   :  { %683 = vmatprep.subr.bf16.mxu1 %v940_v0  ;;  %699 = vmatprep.mubr.msk.bf16.mxu1 %vm941_vm0, %v940_v0  ;;  %v764_v6 = vld [vmem:[#allocation7 + $0x8] sm:$0xff]   ;;  %v759_v7 = vld [vmem:[#allocation5 + $0x20] sm:$0xff]   ;;  %v765_v8 = vld [vmem:[#allocation7 + $0x10] sm:$0xff]  }
  0x5d   :  { %664 = vmatpush3.bf16.msra.mxu0 %v755_v1  ;;  %684 = vmatpush3.bf16.msra.mxu1 %v763_v4  ;;  %v760_v9 = vld [vmem:[#allocation5 + $0x28] sm:$0xff]   ;;  %v766_v10 = vld [vmem:[#allocation7 + $0x18] sm:$0xff]   ;;  %v761_v11 = vld [vmem:[#allocation5 + $0x30] sm:$0xff]  }
  0x5e   :  { %665 = vmatprep.subr.bf16.mxu0 %v940_v0  ;;  %685 = vmatprep.subr.bf16.mxu1 %v940_v0  ;;  %v767_v12 = vld [vmem:[#allocation7 + $0x20] sm:$0xff]   ;;  %v762_v13 = vld [vmem:[#allocation5 + $0x38] sm:$0xff]   ;;  %v102_v14 = vld [vmem:[#allocation2] sm:$0xff] }
  0x5f   :  { %v103_v15 = vld [vmem:[#allocation2 + $0x8] sm:$0xff]  ;;  %v768_v16 = vld [vmem:[#allocation7 + $0x28] sm:$0xff]   ;;  %v769_v18 = vld [vmem:[#allocation7 + $0x30] sm:$0xff]  }
  0x60   :  { %v104_v17 = vpack.c.bf16 %v103_v15, %v102_v14  ;;  %v770_v19 = vld [vmem:[#allocation7 + $0x38] sm:$0xff]   ;;  %v771_v20 = vld [vmem:[#allocation8] sm:$0xff]   ;;  %v772_v21 = vld [vmem:[#allocation8 + $0x8] sm:$0xff]  }
  0x61   :  { %666 = vmatpush3.bf16.msra.mxu0 %v756_v2  ;;  %686 = vmatpush3.bf16.msra.mxu1 %v764_v6  ;;  %v773_v22 = vld [vmem:[#allocation8 + $0x10] sm:$0xff]   ;;  %v774_v23 = vld [vmem:[#allocation8 + $0x18] sm:$0xff]   ;;  %v775_v24 = vld [vmem:[#allocation8 + $0x20] sm:$0xff]  }
  0x62   :  { %667 = vmatprep.subr.bf16.mxu0 %v940_v0  ;;  %687 = vmatprep.subr.bf16.mxu1 %v940_v0  ;;  %v776_v25 = vld [vmem:[#allocation8 + $0x28] sm:$0xff]   ;;  %v591_v26 = vld [vmem:[%s1137_s2] ss:$0 sm:$0xff]  ;;  %v778_v37 = vld [vmem:[#allocation8 + $0x38] sm:$0xff]  }
  0x63   :  { %v777_v36 = vld [vmem:[#allocation8 + $0x30] sm:$0xff]   ;;  %v779_v38 = vld [vmem:[#allocation10] sm:$0xff]   ;;  %v780_v39 = vld [vmem:[#allocation10 + $0x8] sm:$0xff]  }
  0x64   :  { %v781_v40 = vld [vmem:[#allocation10 + $0x10] sm:$0xff]   ;;  %v782_v41 = vld [vmem:[#allocation10 + $0x18] sm:$0xff]   ;;  %v783_v42 = vld [vmem:[#allocation10 + $0x20] sm:$0xff]  }
  0x65   :  { %668 = vmatpush3.bf16.msra.mxu0 %v757_v3  ;;  %688 = vmatpush3.bf16.msra.mxu1 %v765_v8  ;;  %v784_v43 = vld [vmem:[#allocation10 + $0x28] sm:$0xff]   ;;  %v600_v44 = vld [vmem:[%s1139_s4] ss:$0 sm:$0xff]  ;;  %v786_v55 = vld [vmem:[#allocation10 + $0x38] sm:$0xff]  }
  0x66   :  { %669 = vmatprep.subr.bf16.mxu0 %v940_v0  ;;  %689 = vmatprep.subr.bf16.mxu1 %v940_v0  ;;  %v785_v54 = vld [vmem:[#allocation10 + $0x30] sm:$0xff]  }
  0x67   :  { %v609_v56 = vld [vmem:[%s1141_s6] ss:$0 sm:$0xff]  ;;  %s942_s6 = smov [#allocation11]  }
  0x68   :  { %s577_s10 = sshll.u32 %s942_s6, 4  ;;  %s578_s10 = int_to_ptr.vmem [resolvable:$true] %s577_s10 }
  0x69   :  { %670 = vmatpush3.bf16.msra.mxu0 %v758_v5  ;;  %690 = vmatpush3.bf16.msra.mxu1 %v766_v10  ;;  %p906_p13 = scmp.lt.s32.totalorder %s578_s10, %s578_s10 }
  0x6a   :  { %671 = vmatprep.subr.bf16.mxu0 %v940_v0  ;;  %691 = vmatprep.subr.bf16.mxu1 %v940_v0 }
  0x6d   :  { %672 = vmatpush3.bf16.msra.mxu0 %v759_v7  ;;  %692 = vmatpush3.bf16.msra.mxu1 %v767_v12 }
  0x6e   :  { %673 = vmatprep.subr.bf16.mxu0 %v940_v0  ;;  %693 = vmatprep.subr.bf16.mxu1 %v940_v0 }
  0x71   :  { %674 = vmatpush3.bf16.msra.mxu0 %v760_v9  ;;  %694 = vmatpush3.bf16.msra.mxu1 %v768_v16 }
  0x72   :  { %675 = vmatprep.subr.bf16.mxu0 %v940_v0  ;;  %695 = vmatprep.subr.bf16.mxu1 %v940_v0 }
  0x75   :  { %676 = vmatpush3.bf16.msra.mxu0 %v761_v11  ;;  %696 = vmatpush3.bf16.msra.mxu1 %v769_v18 }
  0x76   :  { %677 = vmatprep.subr.bf16.mxu0 %v940_v0  ;;  %697 = vmatprep.subr.bf16.mxu1 %v940_v0 }
  0x79   :  { %678 = vmatpush3.bf16.msra.mxu0 %v762_v13  ;;  %698 = vmatpush3.bf16.msra.mxu1 %v770_v19 }
  0x7a   :  { %703 = vmatprep.subr.bf16.mxu0 %v940_v0  ;;  %723 = vmatprep.subr.bf16.mxu1 %v940_v0 }
  0x7c   :  { %680 = vmatmul.mubr.bf16.vlgmr.msra.gmra.mrb[0].mxu0 %v104_v17 }
  0x7d   :  { %719 = vmatprep.mubr.msk.bf16.mxu0 %vm941_vm0, %v940_v0  ;;  %704 = vmatpush3.bf16.msra.mxu0 %v771_v20 }
  0x7e   :  { %705 = vmatprep.subr.bf16.mxu0 %v940_v0 }
  0x81   :  { %706 = vmatpush3.bf16.msra.mxu0 %v772_v21 }
  0x82   :  { %707 = vmatprep.subr.bf16.mxu0 %v940_v0 }
  0x85   :  { %708 = vmatpush3.bf16.msra.mxu0 %v773_v22 }
  0x86   :  { %709 = vmatprep.subr.bf16.mxu0 %v940_v0 }
  0x89   :  { %710 = vmatpush3.bf16.msra.mxu0 %v774_v23 }
  0x8a   :  { %711 = vmatprep.subr.bf16.mxu0 %v940_v0 }
  0x8d   :  { %712 = vmatpush3.bf16.msra.mxu0 %v775_v24 }
  0x8e   :  { %713 = vmatprep.subr.bf16.mxu0 %v940_v0 }
  0x91   :  { %714 = vmatpush3.bf16.msra.mxu0 %v776_v25 }
  0x92   :  { %715 = vmatprep.subr.bf16.mxu0 %v940_v0 }
  0x95   :  { %716 = vmatpush3.bf16.msra.mxu0 %v777_v36 }
  0x96   :  { %717 = vmatprep.subr.bf16.mxu0 %v940_v0 }
  0x99   :  { %718 = vmatpush3.bf16.msra.mxu0 %v778_v37 }
 0x14f   :  { %v210_v27 = vpop.f32.mrb[0].mxu0 }
 0x150   :  { %v211_v28 = vadd.f32 %v591_v26, %v210_v27  ;;  %v681_v29 = vpop.f32.mrb[1].mxu0 }
 0x151   :  { %v213_v30 = vpop.f32.mrb[2].mxu0 }
 0x152   :  { %v214_v31 = vadd.f32 %v591_v26, %v213_v30  ;;  %v682_v32 = vpop.f32.mrb[3].mxu0  ;;  %v217_v33 = vmax.f32 %v211_v28, 0.0 }
 0x154   :  { %v218_v34 = vmax.f32 %v214_v31, 0.0 }
 0x156   :  { %v219_v35 = vpack.c.bf16 %v218_v34, %v217_v33 }
 0x158   :  { %700 = vmatmul.mubr.bf16.vlgmr.msra.gmra.mrb[0].mxu1 %v219_v35 }
 0x159   :  { %739 = vmatprep.mubr.msk.bf16.mxu1 %vm941_vm0, %v940_v0  ;;  %724 = vmatpush3.bf16.msra.mxu1 %v779_v38 }
 0x15a   :  { %725 = vmatprep.subr.bf16.mxu1 %v940_v0 }
 0x15d   :  { %726 = vmatpush3.bf16.msra.mxu1 %v780_v39 }
 0x15e   :  { %727 = vmatprep.subr.bf16.mxu1 %v940_v0 }
 0x161   :  { %728 = vmatpush3.bf16.msra.mxu1 %v781_v40 }
 0x162   :  { %729 = vmatprep.subr.bf16.mxu1 %v940_v0 }
 0x165   :  { %730 = vmatpush3.bf16.msra.mxu1 %v782_v41 }
 0x166   :  { %731 = vmatprep.subr.bf16.mxu1 %v940_v0 }
 0x169   :  { %732 = vmatpush3.bf16.msra.mxu1 %v783_v42 }
 0x16a   :  { %733 = vmatprep.subr.bf16.mxu1 %v940_v0 }
 0x16d   :  { %734 = vmatpush3.bf16.msra.mxu1 %v784_v43 }
 0x16e   :  { %735 = vmatprep.subr.bf16.mxu1 %v940_v0 }
 0x171   :  { %736 = vmatpush3.bf16.msra.mxu1 %v785_v54 }
 0x172   :  { %737 = vmatprep.subr.bf16.mxu1 %v940_v0  ;;  %v618_v0 = vld [vmem:[%s1143_s8] ss:$0 sm:$0xff]  ;;  %s901_s8 = scalar_lea.vmem %s578_s10, 256 }
 0x173   :  { %p902_p12 = scmp.ne.s32.totalorder %s578_s10, %s901_s8  ;;  %p907_p0 = scmp.lt.s32.totalorder %s901_s8, %s901_s8 }
 0x175   :  { %738 = vmatpush3.bf16.msra.mxu1 %v786_v55  ;;  %p908_p1 = por %p907_p0, %p906_p13 }
 0x177   :  { %p909_p2 = pnand %p908_p1, %p902_p12 }
 0x22b   :  { %v325_v45 = vpop.f32.mrb[0].mxu1 }
 0x22c   :  { %v326_v46 = vadd.f32 %v600_v44, %v325_v45  ;;  %v701_v47 = vpop.f32.mrb[1].mxu1 }
 0x22d   :  { %v328_v48 = vpop.f32.mrb[2].mxu1 }
 0x22e   :  { %v329_v49 = vadd.f32 %v600_v44, %v328_v48  ;;  %v702_v50 = vpop.f32.mrb[3].mxu1  ;;  %v332_v51 = vmax.f32 %v326_v46, 0.0 }
 0x230   :  { %v333_v52 = vmax.f32 %v329_v49, 0.0 }
 0x232   :  { %v334_v53 = vpack.c.bf16 %v333_v52, %v332_v51 }
 0x234   :  { %720 = vmatmul.mubr.bf16.vlgmr.msra.gmra.mrb[4].mxu0 %v334_v53 }
 0x307   :  { %v440_v57 = vpop.f32.mrb[4].mxu0 }
 0x308   :  { %v441_v58 = vadd.f32 %v609_v56, %v440_v57  ;;  %v721_v59 = vpop.f32.mrb[5].mxu0 }
 0x309   :  { %v443_v60 = vpop.f32.mrb[6].mxu0 }
 0x30a   :  { %v444_v61 = vadd.f32 %v609_v56, %v443_v60  ;;  %v722_v62 = vpop.f32.mrb[7].mxu0  ;;  %v447_v63 = vmax.f32 %v441_v58, 0.0 }
 0x30c   :  { %v448_v1 = vmax.f32 %v444_v61, 0.0 }
 0x30e   :  { %v449_v2 = vpack.c.bf16 %v448_v1, %v447_v63 }
 0x310   :  { %740 = vmatmul.mubr.bf16.vlgmr.msra.gmra.mrb[4].mxu1 %v449_v2 }
 0x3e3   :  { %v555_v3 = vpop.f32.mrb[4].mxu1 }
 0x3e4   :  { %v556_v4 = vadd.f32 %v618_v0, %v555_v3  ;;  %v741_v5 = vpop.f32.mrb[5].mxu1 }
 0x3e5   :  { %v558_v6 = vpop.f32.mrb[6].mxu1 }
 0x3e6   :  { %v562_v7 = vmul.f32 0.5, %v556_v4  ;;  %v559_v8 = vadd.f32 %v618_v0, %v558_v6  ;;  %v742_v9 = vpop.f32.mrb[7].mxu1 }
 0x3e8   :  { %787 = vtanh.f32 %v562_v7  ;;  %v563_v10 = vmul.f32 0.5, %v559_v8 }
 0x3ea   :  { %789 = vtanh.f32 %v563_v10 }
 0x3f2   :  { %v788_v11 = vpop.eup %787 }
 0x3f3   :  { %v566_v12 = vmul.f32 2.0, %v788_v11 }
 0x3f4   :  { %v790_v13 = vpop.eup %789 }
 0x3f5   :  { %v568_v14 = vadd.f32 3.0, %v566_v12  ;;  %v567_v15 = vmul.f32 2.0, %v790_v13 }
 0x3f7   :  { %570 = vst [vmem:[#allocation11] sm:$0xff] %v568_v14  ;;  %v569_v16 = vadd.f32 3.0, %v567_v15 }
 0x3f9   :  { %571 = vst [vmem:[#allocation11 + $0x8] sm:$0xff] %v569_v16 }
 0x3fa   :  { %912 = shalt.err (!%p909_p2)
}
 0x3fb   :  { %s913_s16 = scalar_lea.hbm %s1144_s9, 256 }
 0x3fc   :  { %p914_p3 = scmp.ne.s32.totalorder %s1144_s9, %s913_s16  ;;  %p917_p4 = scmp.lt.u32.totalorder %s913_s16, %s1144_s9 }
 0x3fe   :  { %p919_p5 = pnand %p917_p4, %p914_p3 }
 0x400   :  { %922 = shalt.err (!%p919_p5)
}
 0x401   :  { %583 = dma.vmem_to_hbm [thread:$0]  %s578_s10, 256, %s1144_s9, [#allocation4], %s936_s5, %s936_s5, %s937_s24  }
 0x402   :  { %929 = dma.done.wait [#allocation4], 256  }
 0x403   :  { %930 = vsyncadd [#allocation4], 4294967040 }
 0x404   :  { %587 = vsyncpa [#allocation3], 1 }
 0x405   :  { %588 = vsyncpa [#allocation6], 1 }
 0x406   :  { %589 = vsyncpa [#allocation9], 1 }
 0x407   :  { %590 = vsyncpa [#allocation4], 1 }

</bundles_post_ra>
